<compile_context>
chip_gen: v7x
topology: tpu7x:2x2x1
jax: 0.10.0
libtpu: 0.0.40
codegen_flags: <defaults>
</compile_context>

<pallas_src>
import functools

import jax
import jax.numpy as jnp
from jax.experimental import pallas as pl
from jax.experimental.pallas import tpu as pltpu


def _gelu_tanh(x):
    # PyTorch nn.functional.gelu(..., approximate='tanh')
    c = jnp.float32(0.7978845608028654)  # sqrt(2/pi)
    return 0.5 * x * (1.0 + jnp.tanh(c * (x + 0.044715 * x * x * x)))


def _gemma_mlp_kernel(x_ref, wg_ref, bg_ref, wu_ref, bu_ref, wd_ref, bd_ref,
                      o_ref, acc_ref):
    j = pl.program_id(1)

    @pl.when(j == 0)
    def _():
        acc_ref[...] = jnp.zeros_like(acc_ref)

    x = x_ref[...]

    # Two separate MXU passes (gate / up) against (H, ti) weight tiles, f32
    # accumulation.  Per-column biases are added per I-tile (correct, since
    # they are sliced the same way as the weights).
    gate = jnp.dot(x, wg_ref[...], preferred_element_type=jnp.float32) + bg_ref[...]
    up = jnp.dot(x, wu_ref[...], preferred_element_type=jnp.float32) + bu_ref[...]

    # GeLU(tanh) * up in f32 (tanh goes to the EUP slot; not the bottleneck).
    h = _gelu_tanh(gate) * up

    # Partial down projection for this intermediate slice, accumulated in f32.
    # NOTE: in the bf16 configuration h is cast back to bf16 for the MXU (the
    # f32 reference keeps it in f32); covered by the bf16 tolerance.
    acc_ref[...] += jnp.dot(h.astype(wd_ref.dtype), wd_ref[...],
                            preferred_element_type=jnp.float32)

    @pl.when(j == pl.num_programs(1) - 1)
    def _():
        # Down-proj bias is added exactly once, at the last I step.
        o_ref[...] = (acc_ref[...] + bd_ref[...]).astype(o_ref.dtype)


def _pick_tile(n, target, align):
    """Largest multiple of `align` that divides n and is <= target (fallback: n)."""
    t = min(target, n)
    t -= t % align
    while t >= align:
        if n % t == 0:
            return t
        t -= align
    return n


def _tpu_defaults():
    """(tm_target, physical_vmem_bytes) per TPU generation."""
    try:
        kind = jax.devices()[0].device_kind.lower()
    except Exception:  # pragma: no cover - no device visible at trace time
        kind = ""
    if "v6" in kind:
        # v6e: 918 TF/s bf16 vs ~1.4 TB/s HBM -> ridge wants tm ~512-768;
        # 128 MiB physical VMEM gives room for the bigger tiles.
        return 640, 128 * 1024 * 1024
    if "7" in kind:
        # v7x: 3.2 TB/s HBM keeps tm=256 roofline-balanced; only 64 MiB VMEM,
        # so shrink ti (not tm) if the working set is tight.
        return 256, 64 * 1024 * 1024
    # v5e (and unknown): near compute-bound at tm=256; 128 MiB VMEM.
    return 256, 128 * 1024 * 1024


def _working_set_bytes(tm, ti, H, act_bytes, w_bytes):
    """Double-buffered pipeline buffers + resident f32 accumulator."""
    x_t = tm * H * act_bytes
    out_t = tm * H * act_bytes
    wg_t = H * ti * w_bytes
    wu_t = H * ti * w_bytes
    wd_t = ti * H * w_bytes
    bias_t = (2 * ti + H) * w_bytes
    acc = tm * H * 4
    return 2 * (x_t + out_t + wg_t + wu_t + wd_t + bias_t) + acc


def _select_tiles(M, H, I, act_bytes, w_bytes, tm, ti):
    tm_target, vmem_phys = _tpu_defaults()
    # Sublane packing: bf16 rows travel in pairs -> tm must be a multiple of 16.
    row_align = 16 if act_bytes == 2 else 8
    if tm is None:
        tm = _pick_tile(M, tm_target, row_align)
    if ti is None:
        ti = _pick_tile(I, 512, 128)
        budget = int(vmem_phys * 0.70)
        # If the working set is tight (e.g. v7x with large hidden), shrink the
        # weight-tile width; arithmetic intensity scales with tm, not ti.
        while ti > 128 and _working_set_bytes(tm, ti, H, act_bytes, w_bytes) > budget:
            new_ti = _pick_tile(I, max(ti // 2, 128), 128)
            if new_ti >= ti:
                break
            ti = new_ti
    ws = _working_set_bytes(tm, ti, H, act_bytes, w_bytes)
    # Derive the scoped-VMEM limit from the actual buffers (+ headroom for
    # Mosaic internal scratch), capped below the generation's physical VMEM.
    vmem_limit = min(max(ws + (16 << 20), 32 << 20), int(vmem_phys * 3 // 4))
    return tm, ti, vmem_limit


@functools.partial(jax.jit, static_argnames=("tm", "ti"))
def gemma_mlp(x2d, wg, bg, wu, bu, wd, bd, *, tm=None, ti=None):
    M, H = x2d.shape
    I = wg.shape[1]

    tm, ti, vmem_limit = _select_tiles(
        M, H, I, x2d.dtype.itemsize, wg.dtype.itemsize, tm, ti)
    row_align = 16 if x2d.dtype.itemsize == 2 else 8
    assert M % tm == 0 and I % ti == 0 and tm % row_align == 0

    grid = (M // tm, I // ti)

    return pl.pallas_call(
        _gemma_mlp_kernel,
        out_shape=jax.ShapeDtypeStruct((M, H), x2d.dtype),
        grid=grid,
        in_specs=[
            pl.BlockSpec((tm, H), lambda i, j: (i, 0)),   # activation tile (resident over j)
            pl.BlockSpec((H, ti), lambda i, j: (0, j)),   # gate_proj weight tile
            pl.BlockSpec((1, ti), lambda i, j: (0, j)),   # gate_proj bias tile
            pl.BlockSpec((H, ti), lambda i, j: (0, j)),   # up_proj weight tile
            pl.BlockSpec((1, ti), lambda i, j: (0, j)),   # up_proj bias tile
            pl.BlockSpec((ti, H), lambda i, j: (j, 0)),   # down_proj weight tile
            pl.BlockSpec((1, H), lambda i, j: (0, 0)),    # down_proj bias (grid-constant, tiny)
        ],
        out_specs=pl.BlockSpec((tm, H), lambda i, j: (i, 0)),
        scratch_shapes=[pltpu.VMEM((tm, H), jnp.float32)],  # down-proj f32 accumulator
        compiler_params=pltpu.CompilerParams(
            dimension_semantics=("parallel", "arbitrary"),
            vmem_limit_bytes=vmem_limit,
        ),
    )(x2d, wg, bg, wu, bu, wd, bd)


def gemma_mlp_ref(x2d, wg, bg, wu, bu, wd, bd):
    x = x2d.astype(jnp.float32)
    gate = x @ wg.astype(jnp.float32) + bg.astype(jnp.float32)
    up = x @ wu.astype(jnp.float32) + bu.astype(jnp.float32)
    h = _gelu_tanh(gate) * up
    return h @ wd.astype(jnp.float32) + bd.astype(jnp.float32)


if __name__ == "__main__":
    # Small shapes consistent with GemmaMLP: batch=2, seq=8,
    # hidden_size=128, intermediate_size=256.
    batch, seq = 2, 8
    hidden, inter = 128, 256

    key = jax.random.PRNGKey(0)
    kx, kg, kbg, ku, kbu, kd, kbd = jax.random.split(key, 7)

    x = jax.random.normal(kx, (batch, seq, hidden), dtype=jnp.float32)

    # Synthetic parameters (PyTorch nn.Linear stores [out, in]; kept as
    # [in, out] for the kernel, biases as [1, out]).
    wg = jax.random.normal(kg, (hidden, inter), dtype=jnp.float32) * 0.02
    bg = jax.random.normal(kbg, (1, inter), dtype=jnp.float32) * 0.02
    wu = jax.random.normal(ku, (hidden, inter), dtype=jnp.float32) * 0.02
    bu = jax.random.normal(kbu, (1, inter), dtype=jnp.float32) * 0.02
    wd = jax.random.normal(kd, (inter, hidden), dtype=jnp.float32) * 0.02
    bd = jax.random.normal(kbd, (1, hidden), dtype=jnp.float32) * 0.02

    x2d = x.reshape(batch * seq, hidden)

    # --- f32 run, ti=128 forces two I steps so the accumulate path is tested.
    out_f32 = jax.block_until_ready(
        gemma_mlp(x2d, wg, bg, wu, bu, wd, bd, ti=128))
    ref = gemma_mlp_ref(x2d, wg, bg, wu, bu, wd, bd)
    assert out_f32.shape == (batch * seq, hidden)
    assert jnp.allclose(out_f32, ref, atol=1e-4, rtol=1e-4)

    # --- bf16 weights/activations (the bandwidth-optimal configuration),
    # default (generation-aware) tile selection, f32 accumulation inside.
    to_bf16 = lambda a: a.astype(jnp.bfloat16)
    out_bf16 = jax.block_until_ready(
        gemma_mlp(to_bf16(x2d), to_bf16(wg), to_bf16(bg), to_bf16(wu),
                  to_bf16(bu), to_bf16(wd), to_bf16(bd)))
    ref_bf16 = gemma_mlp_ref(to_bf16(x2d), to_bf16(wg), to_bf16(bg), to_bf16(wu),
                             to_bf16(bu), to_bf16(wd), to_bf16(bd))
    assert out_bf16.dtype == jnp.bfloat16
    assert jnp.allclose(out_bf16.astype(jnp.float32), ref_bf16, atol=2e-2, rtol=2e-2)

    # Restore [batch, seq, hidden] like the PyTorch module's output.
    out3d = out_f32.reshape(batch, seq, hidden)
    assert out3d.shape == (batch, seq, hidden)

    print("KERNEL_OK")
</pallas_src>

<mosaic_0001>
module attributes {stable_mosaic.version = 11 : i64} {
  func.func @_gemma_mlp_kernel(%arg0: i32, %arg1: i32, %arg2: memref<16x128xf32, #tpu.memory_space<vmem>>, %arg3: memref<128x128xf32, #tpu.memory_space<vmem>>, %arg4: memref<1x128xf32, #tpu.memory_space<vmem>>, %arg5: memref<128x128xf32, #tpu.memory_space<vmem>>, %arg6: memref<1x128xf32, #tpu.memory_space<vmem>>, %arg7: memref<128x128xf32, #tpu.memory_space<vmem>>, %arg8: memref<1x128xf32, #tpu.memory_space<vmem>>, %arg9: memref<16x128xf32, #tpu.memory_space<vmem>>, %arg10: memref<16x128xf32, #tpu.memory_space<vmem>>) attributes {dimension_semantics = [#tpu.dimension_semantics<parallel>, #tpu.dimension_semantics<arbitrary>], iteration_bounds = array<i64: 1, 2>, scalar_prefetch = 0 : i64, scratch_operands = 1 : i64, tpu.core_type = #tpu.core_type<tc>, window_params = [{transform_indices = @transform_0, window_bounds = array<i64: 16, 128>}, {transform_indices = @transform_1, window_bounds = array<i64: 128, 128>}, {transform_indices = @transform_2, window_bounds = array<i64: 1, 128>}, {transform_indices = @transform_3, window_bounds = array<i64: 128, 128>}, {transform_indices = @transform_4, window_bounds = array<i64: 1, 128>}, {transform_indices = @transform_5, window_bounds = array<i64: 128, 128>}, {pipeline_mode = #tpu.pipeline_mode<synchronous>, transform_indices = @transform_6, window_bounds = array<i64: 1, 128>}, {transform_indices = @transform_7, window_bounds = array<i64: 16, 128>}]} {
    %c0_i32 = arith.constant 0 : i32
    %0 = arith.cmpi eq, %arg1, %c0_i32 : i32
    %1 = arith.extui %0 : i1 to i32
    %c0_i32_0 = arith.constant 0 : i32
    %2 = arith.cmpi ne, %1, %c0_i32_0 : i32
    scf.if %2 {
      %cst_23 = arith.constant 0.000000e+00 : f32
      %36 = vector.broadcast %cst_23 : f32 to vector<16x128xf32>
      %c0_24 = arith.constant 0 : index
      %c0_25 = arith.constant 0 : index
      %37 = vector.load %arg10[%c0_24, %c0_25] : memref<16x128xf32, #tpu.memory_space<vmem>>, vector<16x128xf32>
      tpu.vector_store %arg10[%c0_24, %c0_25], %36 {strides = array<i32>} : memref<16x128xf32, #tpu.memory_space<vmem>>, vector<16x128xf32>,
    } else {
    }
    %c0 = arith.constant 0 : index
    %c0_1 = arith.constant 0 : index
    %3 = vector.load %arg2[%c0, %c0_1] : memref<16x128xf32, #tpu.memory_space<vmem>>, vector<16x128xf32>
    %c0_2 = arith.constant 0 : index
    %c0_3 = arith.constant 0 : index
    %4 = vector.load %arg3[%c0_2, %c0_3] : memref<128x128xf32, #tpu.memory_space<vmem>>, vector<128x128xf32>
    %cst = arith.constant dense<0.000000e+00> : vector<16x128xf32>
    %5 = tpu.matmul %3, %4, %cst {dimension_numbers = #tpu.dot_dimension_numbers<[1], [0], [0], [1], [0, 0, 1, 1], [], []>} : vector<16x128xf32>, vector<128x128xf32>, vector<16x128xf32> -> vector<16x128xf32>
    %c0_4 = arith.constant 0 : index
    %c0_5 = arith.constant 0 : index
    %6 = vector.load %arg4[%c0_4, %c0_5] : memref<1x128xf32, #tpu.memory_space<vmem>>, vector<1x128xf32>
    %7 = vector.broadcast %6 : vector<1x128xf32> to vector<16x128xf32>
    %8 = arith.addf %5, %7 : vector<16x128xf32>
    %c0_6 = arith.constant 0 : index
    %c0_7 = arith.constant 0 : index
    %9 = vector.load %arg5[%c0_6, %c0_7] : memref<128x128xf32, #tpu.memory_space<vmem>>, vector<128x128xf32>
    %cst_8 = arith.constant dense<0.000000e+00> : vector<16x128xf32>
    %10 = tpu.matmul %3, %9, %cst_8 {dimension_numbers = #tpu.dot_dimension_numbers<[1], [0], [0], [1], [0, 0, 1, 1], [], []>} : vector<16x128xf32>, vector<128x128xf32>, vector<16x128xf32> -> vector<16x128xf32>
    %c0_9 = arith.constant 0 : index
    %c0_10 = arith.constant 0 : index
    %11 = vector.load %arg6[%c0_9, %c0_10] : memref<1x128xf32, #tpu.memory_space<vmem>>, vector<1x128xf32>
    %12 = vector.broadcast %11 : vector<1x128xf32> to vector<16x128xf32>
    %13 = arith.addf %10, %12 : vector<16x128xf32>
    %cst_11 = arith.constant 5.000000e-01 : f32
    %14 = vector.broadcast %cst_11 : f32 to vector<16x128xf32>
    %15 = arith.mulf %14, %8 : vector<16x128xf32>
    %cst_12 = arith.constant 4.471500e-02 : f32
    %16 = vector.broadcast %cst_12 : f32 to vector<16x128xf32>
    %17 = arith.mulf %16, %8 : vector<16x128xf32>
    %18 = arith.mulf %17, %8 : vector<16x128xf32>
    %19 = arith.mulf %18, %8 : vector<16x128xf32>
    %20 = arith.addf %8, %19 : vector<16x128xf32>
    %cst_13 = arith.constant 0.797884583 : f32
    %21 = vector.broadcast %cst_13 : f32 to vector<16x128xf32>
    %22 = arith.mulf %21, %20 : vector<16x128xf32>
    %23 = math.tanh %22 : vector<16x128xf32>
    %cst_14 = arith.constant 1.000000e+00 : f32
    %24 = vector.broadcast %cst_14 : f32 to vector<16x128xf32>
    %25 = arith.addf %24, %23 : vector<16x128xf32>
    %26 = arith.mulf %15, %25 : vector<16x128xf32>
    %27 = arith.mulf %26, %13 : vector<16x128xf32>
    %c0_15 = arith.constant 0 : index
    %c0_16 = arith.constant 0 : index
    %28 = vector.load %arg10[%c0_15, %c0_16] : memref<16x128xf32, #tpu.memory_space<vmem>>, vector<16x128xf32>
    %c0_17 = arith.constant 0 : index
    %c0_18 = arith.constant 0 : index
    %29 = vector.load %arg7[%c0_17, %c0_18] : memref<128x128xf32, #tpu.memory_space<vmem>>, vector<128x128xf32>
    %cst_19 = arith.constant dense<0.000000e+00> : vector<16x128xf32>
    %30 = tpu.matmul %27, %29, %cst_19 {dimension_numbers = #tpu.dot_dimension_numbers<[1], [0], [0], [1], [0, 0, 1, 1], [], []>} : vector<16x128xf32>, vector<128x128xf32>, vector<16x128xf32> -> vector<16x128xf32>
    %31 = arith.addf %28, %30 : vector<16x128xf32>
    %c0_20 = arith.constant 0 : index
    %c0_21 = arith.constant 0 : index
    %32 = vector.load %arg10[%c0_20, %c0_21] : memref<16x128xf32, #tpu.memory_space<vmem>>, vector<16x128xf32>
    tpu.vector_store %arg10[%c0_20, %c0_21], %31 {strides = array<i32>} : memref<16x128xf32, #tpu.memory_space<vmem>>, vector<16x128xf32>,
    %c1_i32 = arith.constant 1 : i32
    %33 = arith.cmpi eq, %arg1, %c1_i32 : i32
    %34 = arith.extui %33 : i1 to i32
    %c0_i32_22 = arith.constant 0 : i32
    %35 = arith.cmpi ne, %34, %c0_i32_22 : i32
    scf.if %35 {
      %c0_23 = arith.constant 0 : index
      %c0_24 = arith.constant 0 : index
      %36 = vector.load %arg10[%c0_23, %c0_24] : memref<16x128xf32, #tpu.memory_space<vmem>>, vector<16x128xf32>
      %c0_25 = arith.constant 0 : index
      %c0_26 = arith.constant 0 : index
      %37 = vector.load %arg8[%c0_25, %c0_26] : memref<1x128xf32, #tpu.memory_space<vmem>>, vector<1x128xf32>
      %38 = vector.broadcast %37 : vector<1x128xf32> to vector<16x128xf32>
      %39 = arith.addf %36, %38 : vector<16x128xf32>
      %c0_27 = arith.constant 0 : index
      %c0_28 = arith.constant 0 : index
      %40 = vector.load %arg9[%c0_27, %c0_28] : memref<16x128xf32, #tpu.memory_space<vmem>>, vector<16x128xf32>
      tpu.vector_store %arg9[%c0_27, %c0_28], %39 {strides = array<i32>} : memref<16x128xf32, #tpu.memory_space<vmem>>, vector<16x128xf32>,
    } else {
    }
    return
  }
  func.func @transform_0(%arg0: i32, %arg1: i32) -> (i32, i32) {
    %c0_i32 = arith.constant 0 : i32
    %c0_i32_0 = arith.constant 0 : i32
    return %arg0, %c0_i32 : i32, i32
  }
  func.func @transform_1(%arg0: i32, %arg1: i32) -> (i32, i32) {
    %c0_i32 = arith.constant 0 : i32
    %c0_i32_0 = arith.constant 0 : i32
    return %c0_i32, %arg1 : i32, i32
  }
  func.func @transform_2(%arg0: i32, %arg1: i32) -> (i32, i32) {
    %c0_i32 = arith.constant 0 : i32
    %c0_i32_0 = arith.constant 0 : i32
    return %c0_i32, %arg1 : i32, i32
  }
  func.func @transform_3(%arg0: i32, %arg1: i32) -> (i32, i32) {
    %c0_i32 = arith.constant 0 : i32
    %c0_i32_0 = arith.constant 0 : i32
    return %c0_i32, %arg1 : i32, i32
  }
  func.func @transform_4(%arg0: i32, %arg1: i32) -> (i32, i32) {
    %c0_i32 = arith.constant 0 : i32
    %c0_i32_0 = arith.constant 0 : i32
    return %c0_i32, %arg1 : i32, i32
  }
  func.func @transform_5(%arg0: i32, %arg1: i32) -> (i32, i32) {
    %c0_i32 = arith.constant 0 : i32
    %c0_i32_0 = arith.constant 0 : i32
    return %arg1, %c0_i32 : i32, i32
  }
  func.func @transform_6(%arg0: i32, %arg1: i32) -> (i32, i32) {
    %c0_i32 = arith.constant 0 : i32
    %c0_i32_0 = arith.constant 0 : i32
    %c0_i32_1 = arith.constant 0 : i32
    return %c0_i32, %c0_i32_0 : i32, i32
  }
  func.func @transform_7(%arg0: i32, %arg1: i32) -> (i32, i32) {
    %c0_i32 = arith.constant 0 : i32
    %c0_i32_0 = arith.constant 0 : i32
    return %arg0, %c0_i32 : i32, i32
  }
}

</mosaic_0001>

<bundles_post_ra>
// kernel: gemma_mlp.1
= control target key start
LH: loop header
LB: loop body
LE: loop exit
PB: predicated region body
PF: predicated region fallthrough
CT: control target
= control target key end

     0   :  { %s1912_s0 = inlined_call_operand.hbm [shape: f32[16,128], index: 0, kind: input, shape index: {}]   ;;  %s1913_s1 = inlined_call_operand.hbm [shape: f32[128,256], index: 1, kind: input, shape index: {}]   ;;  %s1914_s2 = inlined_call_operand.vmem [shape: f32[1,256], index: 2, kind: input, shape index: {}]   ;;  %s1915_s3 = inlined_call_operand.hbm [shape: f32[128,256], index: 3, kind: input, shape index: {}]   ;;  %s1916_s4 = inlined_call_operand.vmem [shape: f32[1,256], index: 4, kind: input, shape index: {}]   ;;  %s1917_s5 = inlined_call_operand.hbm [shape: f32[256,128], index: 5, kind: input, shape index: {}]   ;;  %s1918_s6 = inlined_call_operand.vmem [shape: f32[1,128], index: 6, kind: input, shape index: {}]   ;;  %s1919_s7 = inlined_call_operand.hbm [shape: f32[16,128], index: 7, kind: output, shape index: {}]  }
   0x1   :  { %1935 = sst [smem:[#allocation19_spill]] %s1913_s1 }
   0x2   :  { %1936 = sst [smem:[#allocation20_spill]] %s1915_s3 }
   0x3   :  { %12 = vsyncpa [#allocation4], 0 }
   0x4   :  { %13 = vsyncpa [#allocation7], 0 }
   0x5   :  { %15 = vsyncpa [#allocation7 + $0x1], 0 }
   0x6   :  { %16 = vsyncpa [#allocation10], 0 }
   0x7   :  { %18 = vsyncpa [#allocation10 + $0x1], 0 }
   0x8   :  { %19 = vsyncpa [#allocation5], 0  ;;  %s1550_s24 = smov 0   ;;  %s1552_s25 = smov 0  }
   0x9   :  { %s1554_s26 = smov 0   ;;  %s1556_s27 = smov 0  }
   0xa   :  { %s1558_s28 = smov 0   ;;  %s1560_s29 = smov 0  }
   0xb LB: > { %1937 = sst [smem:[#allocation16_spill]] %s1497_s29  ;;  %s34_s30 = sadd.s32 1, %s1493_s28  ;;  %s1497_s29 = sphi %s1560_s29, %s25_s29   ;;  %s1493_s28 = sphi %s1558_s28, %s1966_s28   ;;  %s1489_s27 = sphi %s1556_s27, %s1965_s27   ;;  %s1485_s26 = sphi %s1554_s26, %s1964_s26   ;;  %s1481_s25 = sphi %s1552_s25, %s1963_s25   ;;  %s1477_s24 = sphi %s1550_s24, %s1962_s24  }
   0xc   : > { %s70_s8 = sadd.s32 1, %s1485_s26  ;;  %p35_p0 = scmp.ge.s32.totalorder %s34_s30, 2 }
   0xd   : > { %p77_p1 = scmp.ne.s32.totalorder %s1485_s26, %s1481_s25  ;;  %p78_p2 = scmp.eq.s32.totalorder %s1497_s29, 0 }
   0xe   : > { %s1968_s30 = smov (%p35_p0, %s34_s30), 0  ;;  %p1227_p5 = scmp.lt.s32.totalorder %s1497_s29, 2 }
   0xf   : > { %1938 = sst [smem:[#allocation17_spill]] %s1968_s30  ;;  %p1587_p3 = por %p78_p2, %p77_p1 }
  0x10   : > { %s67_s10 = ssub.s32 %s1493_s28, %s1968_s30  ;;  %s277_s11 = sand.u32 1, %s1497_s29  }
  0x11   : > { %p68_p4 = scmp.eq.s32.totalorder %s67_s10, 0  ;;  %s1920_s12 = sand.u32 1, %s1485_s26  }
  0x12   : > { %s1601_s14 = sshll.u32 %s1920_s12, 7  ;;  %s922_s15 = sshll.u32 %s1493_s28, 7 }
  0x13   : > { %s1597_s13 = scalar_select %p68_p4, %s1485_s26, %s70_s8  }
  0x14   : > { %s1941_s1 = sld [smem:[#allocation19_spill]]  ;;  %s281_s19 = scalar_lea.vmem [#allocation6], %s1601_s14 }
  0x15   : > { %1940 = sst [smem:[#allocation18_spill]] %s1597_s13  ;;  %s287_s20 = sshll.u32 %s281_s19, 4  ;;  %s1610_s20 = int_to_ptr.vmem [resolvable:$true] %s287_s20 }
  0x16   : > { %p1614_p6 = pnand %p1227_p5, %p1587_p3  ;;  %s1943_s3 = sld [smem:[#allocation20_spill]] }
  0x17   : > { %s1623_s10 = scalar_lea.sflag [#allocation7], %s277_s11 }
  0x18   : > { %s1942_s21 = scalar_select %p1614_p6, 1, 0 }
  0x19   : > { %p1629_p8 = pneg %p1614_p6 }
  0x1a   : > { %s1607_s18 = scalar_lea.hbm %s1941_s1, %s922_s15  ;;  %s1296_s22 = scalar_lea.hbm %s1941_s1, 4096 }
  0x1b   : > { %s1291_s16 = scalar_lea.hbm %s1607_s18, 2048  ;;  %p1297_p11 = scmp.lt.u32.totalorder %s1607_s18, %s1941_s1 }
  0x1c   : > { %s1621_s8 = scalar_lea.hbm %s1943_s3, %s922_s15  ;;  %p1292_p7 = scmp.ne.s32.totalorder %s1607_s18, %s1291_s16 }
  0x1d   : > { %s1944_s17 = scalar_select %p1629_p8, 1, 0 }
  0x1e   : > { %p1294_p9 = pnand %p1629_p8, %p1292_p7  ;;  %p1298_p12 = scmp.lt.u32.totalorder %s1296_s22, %s1291_s16 }
  0x1f   : > { %p1300_p0 = scmp.lt.u32.totalorder %s1291_s16, %s1607_s18 }
  0x20   : > { %p1295_p10 = pneg %p1294_p9  ;;  %p1299_p13 = por %p1298_p12, %p1297_p11 }
  0x22   : > { %p1301_p1 = por %p1300_p0, %p1299_p13 }
  0x24   : > { %p1302_p2 = pnand %p1301_p1, %p1295_p10 }
  0x26   : > { %1305 = shalt.err (!%p1302_p2)
}
  0x27   : > { %s1306_s11 = scalar_lea.vmem %s1610_s20, 2048  ;;  %s1499_s9 = smov [#allocation6]  }
  0x28   : > { %p1307_p3 = scmp.ne.s32.totalorder %s1610_s20, %s1306_s11  ;;  %s1311_s19 = sshll.u32 %s1499_s9, 4  ;;  %s1312_s19 = int_to_ptr.vmem [resolvable:$false] %s1311_s19 }
  0x29   : > { %s1313_s23 = scalar_lea.vmem %s1312_s19, 4096  ;;  %p1314_p7 = scmp.lt.s32.totalorder %s1610_s20, %s1312_s19 }
  0x2a   : > { %p1309_p4 = pnand %p1307_p3, %p1629_p8  ;;  %p1315_p9 = scmp.lt.s32.totalorder %s1313_s23, %s1306_s11 }
  0x2c   : > { %p1310_p5 = pneg %p1309_p4  ;;  %p1316_p11 = por %p1315_p9, %p1314_p7 }
  0x2e   : > { %p1317_p12 = pnand %p1316_p11, %p1310_p5 }
  0x30   : > { %1320 = shalt.err (!%p1317_p12)
}
  0x31   : > { %s1921_s16 = smov 256   ;;  %s1922_s22 = smov 128  }
  0x32   : > { %s1924_s15 = smov 8   ;;  %s1657_s11 = sadd.s32 4294967295, %s1497_s29  }
  0x33   : > { %1219 = dma.hbm_to_vmem [thread:$0]  (!%p1614_p6), %s1607_s18, 2048, %s1610_s20, %s1623_s10, %s1921_s16, %s1922_s22, %s1924_s15  }
  0x34   : > { %p83_p10 = scmp.ne.s32.totalorder %s1481_s25, %s1477_s24  ;;  %p1927_p13 = scmp.eq.s32.totalorder %s1657_s11, 0 }
  0x35   : > { %p918_p0 = scmp.ge.s32.totalorder %s1497_s29, 1  ;;  %p245_p1 = scmp.lt.s32.totalorder %s1497_s29, 3 }
  0x36   : > { %p1666_p2 = por %p1927_p13, %p83_p10  ;;  %s1503_s20 = smov [#allocation3]  }
  0x37   : > { %p1670_p3 = pnand %p918_p0, %p245_p1  ;;  %s260_s19 = sshll.u32 %s1503_s20, 4  ;;  %s1676_s19 = int_to_ptr.vmem [resolvable:$true] %s260_s19 }
  0x38   : > { %s1945_s9 = scalar_select %p1666_p2, 1, 0 }
  0x39   : > { %s1946_s18 = scalar_select %p1670_p3, 1, 0 }
  0x3a   : > { %p1212_p4 = pneg %p1670_p3  ;;  %s307_s24 = scalar_lea.vmem [#allocation8], %s1601_s14 }
  0x3b   : > { %s313_s23 = sshll.u32 %s307_s24, 4  ;;  %s1321_s16 = scalar_lea.hbm %s1621_s8, 2048  ;;  %s1685_s23 = int_to_ptr.vmem [resolvable:$true] %s313_s23 }
  0x3c   : > { %p1681_p5 = pnand %p1212_p4, %p1927_p13  ;;  %p1322_p7 = scmp.ne.s32.totalorder %s1621_s8, %s1321_s16 }
  0x3d   : > { %s1326_s15 = scalar_lea.hbm %s1943_s3, 4096  ;;  %p1327_p12 = scmp.lt.u32.totalorder %s1621_s8, %s1943_s3 }
  0x3e   : > { %s1947_s12 = scalar_select %p1681_p5, 1, 0 }
  0x3f   : > { %p1324_p9 = pnand %p1322_p7, %p1629_p8  ;;  %p1328_p10 = scmp.lt.u32.totalorder %s1326_s15, %s1321_s16 }
  0x40   : > { %p1330_p1 = scmp.lt.u32.totalorder %s1321_s16, %s1621_s8 }
  0x41   : > { %p1325_p11 = pneg %p1324_p9  ;;  %p1329_p0 = por %p1328_p10, %p1327_p12 }
  0x43   : > { %p1331_p4 = por %p1330_p1, %p1329_p0 }
  0x45   : > { %p1332_p13 = pnand %p1331_p4, %p1325_p11 }
  0x47   : > { %1335 = shalt.err (!%p1332_p13)
}
  0x48   : > { %s1336_s24 = scalar_lea.vmem %s1685_s23, 2048  ;;  %s1504_s22 = smov [#allocation8]  }
  0x49   : > { %p1337_p7 = scmp.ne.s32.totalorder %s1685_s23, %s1336_s24  ;;  %s1341_s20 = sshll.u32 %s1504_s22, 4  ;;  %s1342_s20 = int_to_ptr.vmem [resolvable:$false] %s1341_s20 }
  0x4a   : > { %s1343_s1 = scalar_lea.vmem %s1342_s20, 4096  ;;  %p1344_p3 = scmp.lt.s32.totalorder %s1685_s23, %s1342_s20 }
  0x4b   : > { %p1339_p9 = pnand %p1337_p7, %p1629_p8  ;;  %p1345_p5 = scmp.lt.s32.totalorder %s1343_s1, %s1336_s24 }
  0x4d   : > { %p1340_p2 = pneg %p1339_p9  ;;  %p1346_p12 = por %p1345_p5, %p1344_p3 }
  0x4f   : > { %p1347_p10 = pnand %p1346_p12, %p1340_p2 }
  0x51   : > { %1350 = shalt.err (!%p1347_p10)
}
  0x52   : > { %s1948_s30 = smov 8   ;;  %s1949_s16 = smov 128  }
  0x53   : > { %s1950_s15 = smov 256   ;;  %s1351_s22 = scalar_lea.hbm %s1912_s0, 256 }
  0x54   : > { %1222 = dma.hbm_to_vmem [thread:$0]  (!%p1614_p6), %s1621_s8, 2048, %s1685_s23, %s1623_s10, %s1950_s15, %s1949_s16, %s1948_s30  }
  0x55   : > { %p1352_p13 = scmp.ne.s32.totalorder %s1912_s0, %s1351_s22  ;;  %p1951_p2 = scmp.ne.s32.totalorder %s1947_s12, 0 }
  0x56   : > { %p1358_p0 = scmp.lt.u32.totalorder %s1351_s22, %s1912_s0 }
  0x57   : > { %p1353_p3 = pneg %p1951_p2 }
  0x59   : > { %p1354_p5 = pnand %p1353_p3, %p1352_p13 }
  0x5b   : > { %p1355_p11 = pneg %p1354_p5 }
  0x5d   : > { %p1360_p1 = pnand %p1358_p0, %p1355_p11 }
  0x5f   : > { %1363 = shalt.err (!%p1360_p1)
}
  0x60   : > { %s1364_s8 = scalar_lea.vmem %s1676_s19, 256  ;;  %p1372_p12 = scmp.lt.s32.totalorder %s1676_s19, %s1676_s19 }
  0x61   : > { %p1365_p4 = scmp.ne.s32.totalorder %s1676_s19, %s1364_s8  ;;  %p1373_p10 = scmp.lt.s32.totalorder %s1364_s8, %s1364_s8 }
  0x63   : > { %p1367_p7 = pnand %p1365_p4, %p1353_p3  ;;  %p1374_p6 = por %p1373_p10, %p1372_p12 }
  0x65   : > { %p1368_p9 = pneg %p1367_p7 }
  0x67   : > { %p1375_p8 = pnand %p1374_p6, %p1368_p9 }
  0x69   : > { %1378 = shalt.err (!%p1375_p8)
}
  0x6a   : > { %1215 = dma.hbm_to_vmem [thread:$0]  (!%p1951_p2), %s1912_s0, 256, %s1676_s19, [#allocation4], %s1949_s16, %s1949_s16, %s1948_s30  }
  0x6b   : > { %s942_s13 = sshll.u32 %s1493_s28, 11  ;;  %s333_s10 = scalar_lea.vmem [#allocation9], %s1601_s14 }
  0x6c   : > { %s340_s23 = sshll.u32 %s333_s10, 4  ;;  %s1741_s20 = scalar_lea.hbm %s1917_s5, %s942_s13  ;;  %s1743_s23 = int_to_ptr.vmem [resolvable:$true] %s340_s23 }
  0x6d   : > { %s1952_s12 = sand.u32 1, %s1485_s26   ;;  %s1379_s1 = scalar_lea.hbm %s1741_s20, 2048 }
  0x6e   : > { %s1747_s24 = scalar_lea.sflag [#allocation10], %s1952_s12  ;;  %p1380_p6 = scmp.ne.s32.totalorder %s1741_s20, %s1379_s1 }
  0x6f   : > { %p1953_p8 = scmp.ne.s32.totalorder %s1944_s17, 0  ;;  %s1384_s8 = scalar_lea.hbm %s1917_s5, 4096 }
  0x70   : > { %p1385_p3 = scmp.lt.u32.totalorder %s1741_s20, %s1917_s5  ;;  %p1386_p5 = scmp.lt.u32.totalorder %s1384_s8, %s1379_s1 }
  0x71   : > { %p1382_p13 = pnand %p1380_p6, %p1953_p8  ;;  %p1388_p0 = scmp.lt.u32.totalorder %s1379_s1, %s1741_s20 }
  0x72   : > { %p1387_p11 = por %p1386_p5, %p1385_p3 }
  0x73   : > { %p1383_p2 = pneg %p1382_p13 }
  0x74   : > { %p1389_p1 = por %p1388_p0, %p1387_p11 }
  0x76   : > { %p1390_p4 = pnand %p1389_p1, %p1383_p2 }
  0x78   : > { %1393 = shalt.err (!%p1390_p4)
}
  0x79   : > { %s1394_s13 = scalar_lea.vmem %s1743_s23, 2048  ;;  %s1505_s10 = smov [#allocation9]  }
  0x7a   : > { %p1395_p7 = scmp.ne.s32.totalorder %s1743_s23, %s1394_s13  ;;  %s1399_s15 = sshll.u32 %s1505_s10, 4  ;;  %s1400_s15 = int_to_ptr.vmem [resolvable:$false] %s1399_s15 }
  0x7b   : > { %s1401_s22 = scalar_lea.vmem %s1400_s15, 4096  ;;  %p1402_p10 = scmp.lt.s32.totalorder %s1743_s23, %s1400_s15 }
  0x7c   : > { %p1397_p9 = pnand %p1395_p7, %p1953_p8  ;;  %p1403_p6 = scmp.lt.s32.totalorder %s1401_s22, %s1394_s13 }
  0x7e   : > { %p1398_p12 = pneg %p1397_p9  ;;  %p1404_p13 = por %p1403_p6, %p1402_p10 }
  0x80   : > { %p1405_p3 = pnand %p1404_p13, %p1398_p12 }
  0x82   : > { %1408 = shalt.err (!%p1405_p3)
}
  0x83   : > { %p1954_p2 = scmp.ne.s32.totalorder %s1942_s21, 0  ;;  %p1955_p8 = scmp.ne.s32.totalorder %s1946_s18, 0 }
  0x84   : > { %p1956_p5 = scmp.eq.s32.totalorder (!%p1955_p8), %s1657_s11, 0 }
  0x85   : > { %1225 = dma.hbm_to_vmem [thread:$0]  (!%p1954_p2), %s1741_s20, 2048, %s1743_s23, %s1747_s24, %s1949_s16, %s1949_s16, %s1948_s30  }
  0x86   : > { %352 = sbr.rel (%p1955_p8) target bundleno = 690 (0x2b2), region = 48 }
  0x8d   : > { %1460 = dma.done.wait (%p1956_p5), [#allocation4], 256   ;;  %p1957_p11 = pmov %p1956_p5 }
  0x8e   : > { %s358_s21 = sand.u32 1, %s1657_s11   ;;  %s360_s17 = sand.u32 1, %s1481_s25  }
  0x8f   : > { %1462 = vsyncadd (%p1957_p11), [#allocation4], 4294967040  ;;  %s930_s12 = sshll.u32 %s360_s17, 7  ;;  %s359_s1 = scalar_lea.sflag [#allocation7], %s358_s21 }
  0x90   : > { %s1782_s14 = scalar_lea.vmem [#allocation6], %s930_s12  ;;  %p1958_p0 = scmp.ne.s32.totalorder %s1945_s9, 0 }
  0x92   : > { %1464 = dma.done.wait (%p1958_p0), %s359_s1, 4096  }
  0x93   : > { %1466 = vsyncadd (%p1958_p0), %s359_s1, 4294963200  ;;  %s1788_s18 = scalar_lea.vmem [#allocation8], %s930_s12  ;;  %s377_s30 = scalar_lea.sflag [#allocation10], %s360_s17 }
  0x94   : > { %s1790_s16 = scalar_lea.vmem [#allocation9], %s930_s12 }
  0x95   : > { %1468 = dma.done.wait (%p1958_p0), %s377_s30, 2048  }
  0x96   : > { %1470 = vsyncadd (%p1958_p0), %s377_s30, 4294965248  ;;  %p423_p1 = scmp.lt.s32.totalorder %s1489_s27, 1  ;;  %p933_p4 = scmp.ne.s32.totalorder %s1489_s27, 0 }
  0x97   : > { %v1506_v0 = vmov (!%p933_p4), 0.0  }
  0x98   : > { %s1798_s23 = scalar_select %p423_p1, %s1489_s27, 1 }
  0x99   : > { %434 = sbr.rel (%p933_p4) target bundleno = 160 (0xa0), region = 68  ;;  %435 = vst [vmem:[#allocation2] sm:$0xff] (!%p933_p4), %v1506_v0  ;;  %436 = vst [vmem:[#allocation2 + $0x8] sm:$0xff] (!%p933_p4), %v1506_v0 }
  0x9a   : > { %s425_s19 = scalar_lea.vmem %s1914_s2, %s1798_s23  ;;  %s428_s29 = scalar_lea.vmem %s1916_s4, %s1798_s23 }
  0xa0 PF: > { %v439_v1 = vld [vmem:[%s1782_s14] sm:$0xff]  ;;  %v440_v2 = vld [vmem:[%s1782_s14 + $0x8] sm:$0xff]  ;;  %v441_v3 = vld [vmem:[%s1782_s14 + $0x10] sm:$0xff]  ;;  %p936_p7 = scmp.ne.s32.totalorder %s1489_s27, 1 }
  0xa1   : > { %v1102_v4 = vpack.c.bf16 %v440_v2, %v439_v1  ;;  %v442_v5 = vld [vmem:[%s1782_s14 + $0x18] sm:$0xff]  ;;  %v443_v7 = vld [vmem:[%s1782_s14 + $0x20] sm:$0xff]  ;;  %v444_v8 = vld [vmem:[%s1782_s14 + $0x28] sm:$0xff] }
  0xa2   : > { %v1106_v6 = vpack.c.bf16 %v442_v5, %v441_v3  ;;  %v537_v9 = vld [vmem:[%s1788_s18] sm:$0xff]  ;;  %v1110_v10 = vpack.c.bf16 %v444_v8, %v443_v7  ;;  %v445_v11 = vld [vmem:[%s1782_s14 + $0x30] sm:$0xff]  ;;  %v446_v12 = vld [vmem:[%s1782_s14 + $0x38] sm:$0xff] }
  0xa3   : > { %1103 = vmatprep.subr.bf16.mxu0 %v1102_v4  ;;  %v538_v13 = vld [vmem:[%s1788_s18 + $0x8] sm:$0xff]  ;;  %v539_v15 = vld [vmem:[%s1788_s18 + $0x10] sm:$0xff]  ;;  %v540_v16 = vld [vmem:[%s1788_s18 + $0x18] sm:$0xff]  ;;  %v1114_v21 = vpack.c.bf16 %v446_v12, %v445_v11 }
  0xa4   : > { %1105 = vmatpush3.bf16.msra.mxu0 %v1102_v4  ;;  %v1134_v14 = vpack.c.bf16 %v538_v13, %v537_v9  ;;  %v437_v17 = vld [vmem:[#allocation3] sm:$0xff]  ;;  %v1138_v18 = vpack.c.bf16 %v540_v16, %v539_v15  ;;  %v541_v19 = vld [vmem:[%s1788_s18 + $0x20] sm:$0xff]  ;;  %v542_v20 = vld [vmem:[%s1788_s18 + $0x28] sm:$0xff] }
  0xa5   : > { %1107 = vmatprep.subr.bf16.mxu0 %v1106_v6  ;;  %1029 = vmatprep.mubr.f32.mxu0 %v437_v17  ;;  %v447_v22 = vld [vmem:[%s1782_s14 + $0x40] sm:$0xff]  ;;  %v448_v23 = vld [vmem:[%s1782_s14 + $0x48] sm:$0xff]  ;;  %v1142_v24 = vpack.c.bf16 %v542_v20, %v541_v19  ;;  %v543_v25 = vld [vmem:[%s1788_s18 + $0x30] sm:$0xff] }
  0xa6   : > { %1064 = vmatprep.mubr.f32.mxu1 %v437_v17  ;;  %1135 = vmatprep.subr.bf16.mxu1 %v1134_v14  ;;  %v544_v26 = vld [vmem:[%s1788_s18 + $0x38] sm:$0xff]  ;;  %v1118_v27 = vpack.c.bf16 %v448_v23, %v447_v22  ;;  %v449_v28 = vld [vmem:[%s1782_s14 + $0x50] sm:$0xff]  ;;  %v545_v31 = vld [vmem:[%s1788_s18 + $0x40] sm:$0xff] }
  0xa7   : > { %1137 = vmatpush3.bf16.msra.mxu1 %v1134_v14  ;;  %v450_v29 = vld [vmem:[%s1782_s14 + $0x58] sm:$0xff]  ;;  %v1146_v30 = vpack.c.bf16 %v544_v26, %v543_v25  ;;  %v546_v32 = vld [vmem:[%s1788_s18 + $0x48] sm:$0xff]  ;;  %v451_v34 = vld [vmem:[%s1782_s14 + $0x60] sm:$0xff] }
  0xa8   : > { %1109 = vmatpush3.bf16.msra.mxu0 %v1106_v6  ;;  %1139 = vmatprep.subr.bf16.mxu1 %v1138_v18  ;;  %v1122_v33 = vpack.c.bf16 %v450_v29, %v449_v28  ;;  %v452_v35 = vld [vmem:[%s1782_s14 + $0x68] sm:$0xff]  ;;  %v1150_v36 = vpack.c.bf16 %v546_v32, %v545_v31  ;;  %v547_v37 = vld [vmem:[%s1788_s18 + $0x50] sm:$0xff]  ;;  %v548_v38 = vld [vmem:[%s1788_s18 + $0x58] sm:$0xff] }
  0xa9   : > { %1111 = vmatprep.subr.bf16.mxu0 %v1110_v10  ;;  %v1126_v39 = vpack.c.bf16 %v452_v35, %v451_v34  ;;  %v453_v40 = vld [vmem:[%s1782_s14 + $0x70] sm:$0xff]  ;;  %v454_v41 = vld [vmem:[%s1782_s14 + $0x78] sm:$0xff]  ;;  %v1154_v42 = vpack.c.bf16 %v548_v38, %v547_v37  ;;  %v549_v43 = vld [vmem:[%s1788_s18 + $0x60] sm:$0xff] }
  0xaa   : > { %v550_v44 = vld [vmem:[%s1788_s18 + $0x68] sm:$0xff]  ;;  %v1130_v45 = vpack.c.bf16 %v454_v41, %v453_v40  ;;  %v551_v47 = vld [vmem:[%s1788_s18 + $0x70] sm:$0xff]  ;;  %v552_v48 = vld [vmem:[%s1788_s18 + $0x78] sm:$0xff] }
  0xab   : > { %1141 = vmatpush3.bf16.msra.mxu1 %v1138_v18  ;;  %v1158_v46 = vpack.c.bf16 %v550_v44, %v549_v43  ;;  %v1162_v49 = vpack.c.bf16 %v552_v48, %v551_v47  ;;  %v438_v50 = vld [vmem:[#allocation3 + $0x8] sm:$0xff]  ;;  %v657_v51 = vld [vmem:[%s1790_s16] sm:$0xff]  ;;  %v658_v52 = vld [vmem:[%s1790_s16 + $0x8] sm:$0xff] }
  0xac   : > { %1113 = vmatpush3.bf16.msra.mxu0 %v1110_v10  ;;  %1143 = vmatprep.subr.bf16.mxu1 %v1142_v24  ;;  %v1166_v53 = vpack.c.bf16 %v658_v52, %v657_v51  ;;  %v659_v54 = vld [vmem:[%s1790_s16 + $0x10] sm:$0xff]  ;;  %v660_v55 = vld [vmem:[%s1790_s16 + $0x18] sm:$0xff]  ;;  %v661_v57 = vld [vmem:[%s1790_s16 + $0x20] sm:$0xff] }
  0xad   : > { %1115 = vmatprep.subr.bf16.mxu0 %v1114_v21  ;;  %v1170_v56 = vpack.c.bf16 %v660_v55, %v659_v54  ;;  %v662_v58 = vld [vmem:[%s1790_s16 + $0x28] sm:$0xff]  ;;  %v663_v60 = vld [vmem:[%s1790_s16 + $0x30] sm:$0xff]  ;;  %v664_v61 = vld [vmem:[%s1790_s16 + $0x38] sm:$0xff] }
  0xae   : > { %v1174_v59 = vpack.c.bf16 %v662_v58, %v661_v57  ;;  %v1178_v62 = vpack.c.bf16 %v664_v61, %v663_v60  ;;  %v665_v63 = vld [vmem:[%s1790_s16 + $0x40] sm:$0xff]  ;;  %v666_v0 = vld [vmem:[%s1790_s16 + $0x48] sm:$0xff]  ;;  %v667_v2 = vld [vmem:[%s1790_s16 + $0x50] sm:$0xff] }
  0xaf   : > { %1145 = vmatpush3.bf16.msra.mxu1 %v1142_v24  ;;  %v1182_v1 = vpack.c.bf16 %v666_v0, %v665_v63  ;;  %v668_v3 = vld [vmem:[%s1790_s16 + $0x58] sm:$0xff]  ;;  %v669_v5 = vld [vmem:[%s1790_s16 + $0x60] sm:$0xff]  ;;  %v670_v6 = vld [vmem:[%s1790_s16 + $0x68] sm:$0xff] }
  0xb0   : > { %1117 = vmatpush3.bf16.msra.mxu0 %v1114_v21  ;;  %1147 = vmatprep.subr.bf16.mxu1 %v1146_v30  ;;  %v1186_v4 = vpack.c.bf16 %v668_v3, %v667_v2  ;;  %v1190_v7 = vpack.c.bf16 %v670_v6, %v669_v5  ;;  %v671_v8 = vld [vmem:[%s1790_s16 + $0x70] sm:$0xff]  ;;  %v672_v9 = vld [vmem:[%s1790_s16 + $0x78] sm:$0xff]  ;;  %v934_v11 = vld [vmem:[%s425_s19] ss:$0 sm:$0xff] }
  0xb1   : > { %1119 = vmatprep.subr.bf16.mxu0 %v1118_v27  ;;  %v1194_v10 = vpack.c.bf16 %v672_v9, %v671_v8  ;;  %v935_v28 = vld [vmem:[%s428_s29] ss:$0 sm:$0xff]  ;;  %v656_v41 = vld [vmem:[#allocation2 + $0x8] sm:$0xff] }
  0xb2   : > { %v937_v48 = vld [vmem:[%s1918_s6] ss:$0 sm:$0xff] (!%p936_p7) }
  0xb3   : > { %1149 = vmatpush3.bf16.msra.mxu1 %v1146_v30 }
  0xb4   : > { %1121 = vmatpush3.bf16.msra.mxu0 %v1118_v27  ;;  %1151 = vmatprep.subr.bf16.mxu1 %v1150_v36 }
  0xb5   : > { %1123 = vmatprep.subr.bf16.mxu0 %v1122_v33 }
  0xb7   : > { %1153 = vmatpush3.bf16.msra.mxu1 %v1150_v36 }
  0xb8   : > { %1125 = vmatpush3.bf16.msra.mxu0 %v1122_v33  ;;  %1155 = vmatprep.subr.bf16.mxu1 %v1154_v42 }
  0xb9   : > { %1127 = vmatprep.subr.bf16.mxu0 %v1126_v39 }
  0xbb   : > { %1157 = vmatpush3.bf16.msra.mxu1 %v1154_v42  ;;  %v655_v42 = vld [vmem:[#allocation2] sm:$0xff] }
  0xbc   : > { %1129 = vmatpush3.bf16.msra.mxu0 %v1126_v39  ;;  %1159 = vmatprep.subr.bf16.mxu1 %v1158_v46 }
  0xbd   : > { %1131 = vmatprep.subr.bf16.mxu0 %v1130_v45 }
  0xbf   : > { %1161 = vmatpush3.bf16.msra.mxu1 %v1158_v46 }
  0xc0   : > { %1133 = vmatpush3.bf16.msra.mxu0 %v1130_v45  ;;  %1163 = vmatprep.subr.bf16.mxu1 %v1162_v49 }
  0xc1   : > { %1167 = vmatprep.subr.bf16.mxu0 %v1166_v53 }
  0xc3   : > { %1030 = vmatmul.mubr.f32.vlgmr.msra.gmra.mrb[0].mxu0 %v438_v50  ;;  %1165 = vmatpush3.bf16.msra.mxu1 %v1162_v49 }
  0xc4   : > { %1169 = vmatpush3.bf16.msra.mxu0 %v1166_v53 }
  0xc5   : > { %1171 = vmatprep.subr.bf16.mxu0 %v1170_v56 }
  0xc6   : > { %1065 = vmatmul.mubr.f32.vlgmr.msra.gmra.mrb[0].mxu1 %v438_v50 }
  0xc8   : > { %1173 = vmatpush3.bf16.msra.mxu0 %v1170_v56 }
  0xc9   : > { %1175 = vmatprep.subr.bf16.mxu0 %v1174_v59 }
  0xcc   : > { %1177 = vmatpush3.bf16.msra.mxu0 %v1174_v59 }
  0xcd   : > { %1179 = vmatprep.subr.bf16.mxu0 %v1178_v62 }
  0xd0   : > { %1181 = vmatpush3.bf16.msra.mxu0 %v1178_v62 }
  0xd1   : > { %1183 = vmatprep.subr.bf16.mxu0 %v1182_v1 }
  0xd4   : > { %1185 = vmatpush3.bf16.msra.mxu0 %v1182_v1 }
  0xd5   : > { %1187 = vmatprep.subr.bf16.mxu0 %v1186_v4 }
  0xd8   : > { %1189 = vmatpush3.bf16.msra.mxu0 %v1186_v4 }
  0xd9   : > { %1191 = vmatprep.subr.bf16.mxu0 %v1190_v7 }
  0xdc   : > { %1193 = vmatpush3.bf16.msra.mxu0 %v1190_v7 }
  0xdd   : > { %1195 = vmatprep.subr.bf16.mxu0 %v1194_v10 }
  0xe0   : > { %1197 = vmatpush3.bf16.msra.mxu0 %v1194_v10 }
 0x196   : > { %v1031_v12 = vpop.f32.mrb[0].mxu0 }
 0x197   : > { %v534_v13 = vadd.f32 %v1031_v12, %v934_v11  ;;  %v528_v14 = vpop.f32.mrb[1].mxu0 }
 0x198   : > { %v529_v15 = vadd.f32 %v934_v11, %v528_v14 }
 0x199   : > { %v638_v16 = vmul.f32 0.044715, %v534_v13  ;;  %v1066_v19 = vpop.f32.mrb[0].mxu1  ;;  %v636_v32 = vmul.f32 0.5, %v534_v13 }
 0x19a   : > { %v637_v17 = vmul.f32 0.044715, %v529_v15  ;;  %v626_v21 = vpop.f32.mrb[1].mxu1  ;;  %v632_v31 = vadd.f32 %v1066_v19, %v935_v28  ;;  %v635_v35 = vmul.f32 0.5, %v529_v15 }
 0x19b   : > { %v640_v18 = vmul.f32 %v638_v16, %v534_v13  ;;  %v627_v34 = vadd.f32 %v935_v28, %v626_v21 }
 0x19c   : > { %v639_v20 = vmul.f32 %v637_v17, %v529_v15 }
 0x19d   : > { %v642_v22 = vmul.f32 %v640_v18, %v534_v13 }
 0x19e   : > { %v641_v23 = vmul.f32 %v639_v20, %v529_v15 }
 0x19f   : > { %v644_v24 = vadd.f32 %v642_v22, %v534_v13 }
 0x1a0   : > { %v643_v25 = vadd.f32 %v641_v23, %v529_v15 }
 0x1a1   : > { %v646_v26 = vmul.f32 0.7978846, %v644_v24 }
 0x1a2   : > { %v645_v27 = vmul.f32 0.7978846, %v643_v25 }
 0x1a3   : > { %1287 = vtanh.f32 %v646_v26 }
 0x1a4   : > { %1289 = vtanh.f32 %v645_v27 }
 0x1ad   : > { %v1288_v29 = vpop.eup %1287 }
 0x1ae   : > { %v1290_v30 = vpop.eup %1289  ;;  %v650_v33 = vadd.f32 1.0, %v1288_v29 }
 0x1af   : > { %v649_v36 = vadd.f32 1.0, %v1290_v30 }
 0x1b0   : > { %v652_v37 = vmul.f32 %v650_v33, %v636_v32 }
 0x1b1   : > { %v651_v38 = vmul.f32 %v649_v36, %v635_v35 }
 0x1b2   : > { %v654_v39 = vmul.f32 %v652_v37, %v632_v31 }
 0x1b3   : > { %v653_v40 = vmul.f32 %v651_v38, %v627_v34 }
 0x1b5   : > { %1099 = vmatprep.mubr.f32.mxu0 %v653_v40 }
 0x1b6   : > { %1100 = vmatmul.mubr.f32.vlgmr.msra.gmra.mrb[2].mxu0 %v654_v39 }
 0x287   : > { %755 = sbr.rel (%p936_p7) target bundleno = 664 (0x298), region = 72 }
 0x289   : > { %v1101_v43 = vpop.f32.mrb[2].mxu0 }
 0x28a   : > { %v749_v44 = vadd.f32 %v1101_v43, %v656_v41  ;;  %v739_v45 = vpop.f32.mrb[3].mxu0 }
 0x28b   : > { %v748_v46 = vadd.f32 %v739_v45, %v655_v42 }
 0x28c   : > { %751 = vst [vmem:[#allocation2 + $0x8] sm:$0xff] %v749_v44 }
 0x28d   : > { %750 = vst [vmem:[#allocation2] sm:$0xff] %v748_v46 }
 0x293   : > { %v757_v49 = vld [vmem:[#allocation2 + $0x8] sm:$0xff] }
 0x294   : > { %v756_v47 = vld [vmem:[#allocation2] sm:$0xff]  ;;  %v766_v51 = vadd.f32 %v937_v48, %v757_v49 }
 0x295   : > { %v765_v50 = vadd.f32 %v937_v48, %v756_v47 }
 0x296   : > { %768 = vst [vmem:[#allocation11 + $0x8] sm:$0xff] %v766_v51 }
 0x297   : > { %767 = vst [vmem:[#allocation11] sm:$0xff] %v765_v50 }
 0x298 PF: > { %p1229_p9 = scmp.eq.s32.totalorder %s1657_s11, 1  ;;  %s1507_s17 = smov [#allocation11]  }
 0x299   : > { %s778_s12 = sshll.u32 %s1507_s17, 4  ;;  %s779_s12 = int_to_ptr.vmem [resolvable:$true] %s778_s12 }
 0x29a   : > { %s1409_s1 = scalar_lea.vmem %s779_s12, 256  ;;  %p1416_p13 = scmp.lt.s32.totalorder %s779_s12, %s779_s12 }
 0x29b   : > { %p1410_p12 = scmp.ne.s32.totalorder %s779_s12, %s1409_s1  ;;  %p1417_p3 = scmp.lt.s32.totalorder %s1409_s1, %s1409_s1 }
 0x29d   : > { %p1411_p10 = pnand %p1410_p12, %p1229_p9  ;;  %p1418_p2 = por %p1417_p3, %p1416_p13 }
 0x29f   : > { %p1412_p6 = pneg %p1411_p10 }
 0x2a1   : > { %p1419_p8 = pnand %p1418_p2, %p1412_p6 }
 0x2a3   : > { %1422 = shalt.err (!%p1419_p8)
}
 0x2a4   : > { %s1423_s18 = scalar_lea.hbm %s1919_s7, 256 }
 0x2a5   : > { %p1424_p5 = scmp.ne.s32.totalorder %s1919_s7, %s1423_s18  ;;  %p1429_p1 = scmp.lt.u32.totalorder %s1423_s18, %s1919_s7 }
 0x2a7   : > { %p1425_p11 = pnand %p1424_p5, %p1229_p9 }
 0x2a9   : > { %p1426_p0 = pneg %p1425_p11 }
 0x2ab   : > { %p1431_p4 = pnand %p1429_p1, %p1426_p0 }
 0x2ad   : > { %1434 = shalt.err (!%p1431_p4)
}
 0x2ae   : > { %s1508_s24 = smov 128   ;;  %s1509_s19 = smov 8  }
 0x2af   : > { %1209 = dma.vmem_to_hbm [thread:$0]  (%p1229_p9), %s779_s12, 256, %s1919_s7, [#allocation5], %s1508_s24, %s1508_s24, %s1509_s19  }
 0x2b0   : > { %1472 = dma.done.wait (%p1229_p9), [#allocation5], 256  }
 0x2b1   : > { %1474 = vsyncadd (%p1229_p9), [#allocation5], 4294967040 }
 0x2b2 PF: > { %s1959_s29 = sld [smem:[#allocation16_spill]]  ;;  %s1960_s9 = sld [smem:[#allocation18_spill]] }
 0x2b3   : > { %s1961_s13 = sld [smem:[#allocation17_spill]]  ;;  %s1962_s24 = smov %s1481_s25 }
 0x2b4   : > { %s1963_s25 = smov %s1485_s26  ;;  %s1965_s27 = smov %s1493_s28 }
 0x2b8   : > { %s25_s29 = sadd.s32 1, %s1959_s29   ;;  %s1964_s26 = smov %s1960_s9 }
 0x2b9   : > { %p22_p7 = scmp.ge.s32.totalorder %s25_s29, 4   ;;  %s1966_s28 = smov %s1961_s13 }
 0x2bb   :  { %24 = sbr.rel (!%p22_p7) target bundleno = 11 (0xb), region = 130 }
 0x2c2   :  { %794 = vsyncpa [#allocation4], 1 }
 0x2c3   :  { %796 = vsyncpa [#allocation4 + $0x1], 1 }
 0x2c4   :  { %797 = vsyncpa [#allocation7], 1 }
 0x2c5   :  { %799 = vsyncpa [#allocation7 + $0x1], 1 }
 0x2c6   :  { %800 = vsyncpa [#allocation10], 1 }
 0x2c7   :  { %802 = vsyncpa [#allocation10 + $0x1], 1 }
 0x2c8   :  { %803 = vsyncpa [#allocation5], 1 }
 0x2c9   :  { %805 = vsyncpa [#allocation5 + $0x1], 1 }

</bundles_post_ra>
